<compile_context>
chip_gen: v7x
topology: tpu7x:2x2x1
jax: 0.10.0
libtpu: 0.0.40
codegen_flags: <defaults>
</compile_context>

<pallas_src>
import functools

import jax
import jax.numpy as jnp
from jax.experimental import pallas as pl
from jax.experimental.pallas import tpu as pltpu


def _round_up(x: int, m: int) -> int:
    return ((x + m - 1) // m) * m


def _cdiv(a: int, b: int) -> int:
    return (a + b - 1) // b


# ----------------------------------------------------------------------------
# Fused kernel: mean cross-entropy loss + accuracy(argmax(logits), label)
# ----------------------------------------------------------------------------
def _ce_acc_kernel(logits_ref, labels_ref, out_ref, acc_ref,
                   *, n_valid, tile_b, n_classes):
    # logits_ref: (tile_b, N)  native dtype (bf16/f32) in VMEM
    # labels_ref: (tile_b, 1)  int32 in VMEM
    # out_ref:    (2,)         f32 in SMEM  -> [mean_loss, mean_accuracy]
    # acc_ref:    (2,)         f32 SMEM scratch -> [loss_sum, correct_count]
    i = pl.program_id(0)

    @pl.when(i == 0)
    def _init():
        acc_ref[0] = jnp.float32(0.0)
        acc_ref[1] = jnp.float32(0.0)

    logits = logits_ref[...].astype(jnp.float32)               # (tile_b, N)
    labels = labels_ref[...]                                    # (tile_b, 1)

    # mask rows past the true batch size (padding added by the wrapper)
    row = jax.lax.broadcasted_iota(jnp.int32, (tile_b, 1), 0)   # (tile_b, 1)
    valid = (i * tile_b + row) < n_valid                        # (tile_b, 1)

    # numerically stable log-sum-exp (exp/log -> EUP)
    m = jnp.max(logits, axis=-1, keepdims=True)                 # (tile_b, 1)
    e = jnp.exp(logits - m)
    lse = jnp.log(jnp.sum(e, axis=-1, keepdims=True)) + m       # (tile_b, 1)

    # gather logits[b, label[b]] via a lane-iota one-hot (VPU select + reduce)
    col = jax.lax.broadcasted_iota(jnp.int32, logits.shape, 1)  # (tile_b, N)
    onehot = col == labels                                      # (tile_b, N)
    picked = jnp.sum(jnp.where(onehot, logits, 0.0),
                     axis=-1, keepdims=True)                    # (tile_b, 1)
    per_loss = jnp.where(valid, lse - picked, 0.0)              # (tile_b, 1)

    # in-kernel argmax with torch-style first-max tie breaking
    first_max = jnp.min(jnp.where(logits == m, col, n_classes),
                        axis=-1, keepdims=True)                 # (tile_b, 1)
    correct = jnp.where(valid & (first_max == labels), 1.0, 0.0)

    acc_ref[0] = acc_ref[0] + jnp.sum(per_loss)
    acc_ref[1] = acc_ref[1] + jnp.sum(correct)

    @pl.when(i == pl.num_programs(0) - 1)
    def _finalize():
        inv_b = jnp.float32(1.0 / n_valid)
        out_ref[0] = acc_ref[0] * inv_b
        out_ref[1] = acc_ref[1] * inv_b


def loss_and_accuracy(logits, label, *, tile_b=1024):
    """logits: (..., N) float (any float dtype), label: (...) int.

    Returns (mean CE loss, mean accuracy of argmax(logits) vs label), both f32.
    """
    N = logits.shape[-1]
    logits2d = logits.reshape(-1, N)                  # keep NATIVE dtype
    labels2d = label.reshape(-1, 1).astype(jnp.int32)
    B = logits2d.shape[0]

    tb = min(tile_b, _round_up(B, 8))                 # sublane-aligned tile
    b_pad = _round_up(B, tb)
    if b_pad != B:
        logits2d = jnp.pad(logits2d, ((0, b_pad - B), (0, 0)))
        labels2d = jnp.pad(labels2d, ((0, b_pad - B), (0, 0)))
    grid = (b_pad // tb,)

    itemsize = jnp.dtype(logits2d.dtype).itemsize
    out = pl.pallas_call(
        functools.partial(_ce_acc_kernel, n_valid=B, tile_b=tb, n_classes=N),
        out_shape=jax.ShapeDtypeStruct((2,), jnp.float32),
        grid_spec=pltpu.PrefetchScalarGridSpec(
            num_scalar_prefetch=0,
            grid=grid,
            in_specs=[
                pl.BlockSpec((tb, N), lambda i: (i, 0)),
                pl.BlockSpec((tb, 1), lambda i: (i, 0)),
            ],
            out_specs=pl.BlockSpec(memory_space=pltpu.MemorySpace.SMEM),
            scratch_shapes=[pltpu.SMEM((2,), jnp.float32)],
        ),
        compiler_params=pltpu.CompilerParams(
            dimension_semantics=("arbitrary",)),      # reduction axis
        cost_estimate=pl.CostEstimate(
            flops=8 * B * N,
            transcendentals=B * N + B,
            bytes_accessed=B * N * itemsize + B * 4 + 8),
    )(logits2d, labels2d)
    return out[0], out[1]


# ----------------------------------------------------------------------------
# Standalone accuracy(pred, label) kernel (API parity), lane-dense layout
# ----------------------------------------------------------------------------
def _acc_kernel(pred_ref, label_ref, out_ref, cnt_ref, *, n_valid):
    # pred_ref/label_ref: (tile_rows, 128) int32 in VMEM (padding uses label=-1)
    # out_ref: (1,) f32 SMEM; cnt_ref: (1,) f32 SMEM scratch
    i = pl.program_id(0)

    @pl.when(i == 0)
    def _init():
        cnt_ref[0] = jnp.float32(0.0)

    eq = (pred_ref[...] == label_ref[...]).astype(jnp.float32)
    cnt_ref[0] = cnt_ref[0] + jnp.sum(eq)

    @pl.when(i == pl.num_programs(0) - 1)
    def _finalize():
        out_ref[0] = cnt_ref[0] * jnp.float32(1.0 / n_valid)


def accuracy(pred, label, *, tile_rows=256):
    """pred: (...) int, label: (...) int -> scalar mean accuracy (f32)."""
    LANES = 128
    pred_flat = pred.reshape(-1).astype(jnp.int32)
    label_flat = label.reshape(-1).astype(jnp.int32)
    n = pred_flat.shape[0]

    rows = _cdiv(n, LANES)
    tr = min(tile_rows, _round_up(rows, 8))
    rows_pad = _round_up(rows, tr)
    total = rows_pad * LANES
    # pad pred with 0, label with -1 -> padding never matches, contributes 0
    pred_p = jnp.pad(pred_flat, (0, total - n),
                     constant_values=0).reshape(rows_pad, LANES)
    label_p = jnp.pad(label_flat, (0, total - n),
                      constant_values=-1).reshape(rows_pad, LANES)
    grid = (rows_pad // tr,)

    out = pl.pallas_call(
        functools.partial(_acc_kernel, n_valid=n),
        out_shape=jax.ShapeDtypeStruct((1,), jnp.float32),
        grid_spec=pltpu.PrefetchScalarGridSpec(
            num_scalar_prefetch=0,
            grid=grid,
            in_specs=[
                pl.BlockSpec((tr, LANES), lambda i: (i, 0)),
                pl.BlockSpec((tr, LANES), lambda i: (i, 0)),
            ],
            out_specs=pl.BlockSpec(memory_space=pltpu.MemorySpace.SMEM),
            scratch_shapes=[pltpu.SMEM((1,), jnp.float32)],
        ),
        compiler_params=pltpu.CompilerParams(
            dimension_semantics=("arbitrary",)),
        cost_estimate=pl.CostEstimate(
            flops=2 * n, transcendentals=0, bytes_accessed=2 * n * 4 + 4),
    )(pred_p, label_p)
    return out[0]


def cross_entropy_loss(logits, label, *, tile_b=1024):
    """Mean cross-entropy (matches nn.CrossEntropyLoss with mean reduction)."""
    loss, _ = loss_and_accuracy(logits, label, tile_b=tile_b)
    return loss


# ----------------------------------------------------------------------------
# Thin JAX analogue of the PyTorch module (glue only; kernels above do the work)
# ----------------------------------------------------------------------------
class FewShotREModelJax:
    def __init__(self, sentence_encoder):
        self.sentence_encoder = sentence_encoder  # kept for parity with __init__
        # self.cost == cross-entropy, implemented by the fused Pallas kernel.

    def forward(self, support, query, N, K, Q):
        raise NotImplementedError  # abstract in the reference as well

    def loss(self, logits, label):
        return cross_entropy_loss(logits, label)

    def accuracy(self, pred, label):
        return accuracy(pred, label)

    def loss_and_accuracy(self, logits, label):
        # fused fast path (single pallas_call, pred derived in-kernel)
        return loss_and_accuracy(logits, label)


if __name__ == "__main__":
    key = jax.random.PRNGKey(0)
    k_logits, k_label, k_enc, k_big = jax.random.split(key, 4)

    # Small few-shot-style shapes: N classes, Q query instances per class.
    N_way, Q_per = 5, 4
    B = N_way * Q_per                         # flattened query batch
    hidden = 32

    # Deterministic "sentence encoder" parameters (shape only; forward is abstract).
    enc_w = jax.random.normal(k_enc, (hidden, N_way), dtype=jnp.float32) * 0.02
    model = FewShotREModelJax(sentence_encoder=enc_w)

    # logits: (N*Q, N)  labels: (N*Q,)
    logits = jax.random.normal(k_logits, (B, N_way), dtype=jnp.float32)
    label = jax.random.randint(k_label, (B,), 0, N_way, dtype=jnp.int32)
    pred = jnp.argmax(logits, axis=-1).astype(jnp.int32)

    # Fused path (single kernel launch for both metrics).
    loss_val, acc_val = model.loss_and_accuracy(logits, label)
    loss_val = jax.block_until_ready(loss_val)
    acc_val = jax.block_until_ready(acc_val)

    # Pure-JAX references (mirror the PyTorch semantics).
    lse = jax.nn.logsumexp(logits, axis=-1)
    ref_loss = jnp.mean(lse - logits[jnp.arange(B), label])
    ref_acc = jnp.mean((pred == label).astype(jnp.float32))
    assert jnp.allclose(loss_val, ref_loss, rtol=1e-5, atol=1e-5), (loss_val, ref_loss)
    assert jnp.allclose(acc_val, ref_acc, rtol=1e-6, atol=1e-6), (acc_val, ref_acc)

    # API-parity paths (loss() and accuracy() standalone).
    l2 = jax.block_until_ready(model.loss(logits, label))
    a2 = jax.block_until_ready(model.accuracy(pred, label))
    assert jnp.allclose(l2, ref_loss, rtol=1e-5, atol=1e-5), (l2, ref_loss)
    assert jnp.allclose(a2, ref_acc, rtol=1e-6, atol=1e-6), (a2, ref_acc)

    # Native bf16 logits path (no wrapper f32 cast; upcast happens in-kernel).
    logits_bf16 = logits.astype(jnp.bfloat16)
    lb, ab = model.loss_and_accuracy(logits_bf16, label)
    lb = jax.block_until_ready(lb)
    ab = jax.block_until_ready(ab)
    logits_b32 = logits_bf16.astype(jnp.float32)
    ref_loss_b = jnp.mean(jax.nn.logsumexp(logits_b32, axis=-1)
                          - logits_b32[jnp.arange(B), label])
    ref_acc_b = jnp.mean((jnp.argmax(logits_b32, axis=-1) == label).astype(jnp.float32))
    assert jnp.allclose(lb, ref_loss_b, rtol=1e-4, atol=1e-4), (lb, ref_loss_b)
    assert jnp.allclose(ab, ref_acc_b, rtol=1e-6, atol=1e-6), (ab, ref_acc_b)

    # Multi-tile grid path (exercises accumulation + tail-row masking).
    B2, N2 = 600, 8
    logits2 = jax.random.normal(k_big, (B2, N2), dtype=jnp.float32)
    label2 = jax.random.randint(jax.random.fold_in(key, 7), (B2,), 0, N2,
                                dtype=jnp.int32)
    l3, a3 = loss_and_accuracy(logits2, label2, tile_b=256)   # grid = 3 steps
    l3 = jax.block_until_ready(l3)
    a3 = jax.block_until_ready(a3)
    lse2 = jax.nn.logsumexp(logits2, axis=-1)
    ref_loss2 = jnp.mean(lse2 - logits2[jnp.arange(B2), label2])
    ref_acc2 = jnp.mean((jnp.argmax(logits2, axis=-1) == label2).astype(jnp.float32))
    assert jnp.allclose(l3, ref_loss2, rtol=1e-5, atol=1e-5), (l3, ref_loss2)
    assert jnp.allclose(a3, ref_acc2, rtol=1e-6, atol=1e-6), (a3, ref_acc2)

    print("KERNEL_OK")
</pallas_src>

<mosaic_0001>
module attributes {stable_mosaic.version = 11 : i64} {
  func.func @_ce_acc_kernel(%arg0: i32, %arg1: memref<24x5xf32, #tpu.memory_space<vmem>>, %arg2: memref<24x1xi32, #tpu.memory_space<vmem>>, %arg3: memref<2xf32, #tpu.memory_space<smem>>, %arg4: memref<2xf32, #tpu.memory_space<smem>>) attributes {dimension_semantics = [#tpu.dimension_semantics<arbitrary>], iteration_bounds = array<i64: 1>, scalar_prefetch = 0 : i64, scratch_operands = 1 : i64, tpu.core_type = #tpu.core_type<tc>, window_params = [{transform_indices = @transform_0, window_bounds = array<i64: 24, 5>}, {transform_indices = @transform_1, window_bounds = array<i64: 24, 1>}, {transform_indices = @transform_2, window_bounds = array<i64: 2>}]} {
    %c0_i32 = arith.constant 0 : i32
    %0 = arith.cmpi eq, %arg0, %c0_i32 : i32
    %1 = arith.extui %0 : i1 to i32
    %c0_i32_0 = arith.constant 0 : i32
    %2 = arith.cmpi ne, %1, %c0_i32_0 : i32
    scf.if %2 {
      %cst_18 = arith.constant 0.000000e+00 : f32
      %c0_19 = arith.constant 0 : index
      %58 = memref.load %arg4[%c0_19] : memref<2xf32, #tpu.memory_space<smem>>
      memref.store %cst_18, %arg4[%c0_19] : memref<2xf32, #tpu.memory_space<smem>>
      %cst_20 = arith.constant 0.000000e+00 : f32
      %c1_21 = arith.constant 1 : index
      %59 = memref.load %arg4[%c1_21] : memref<2xf32, #tpu.memory_space<smem>>
      memref.store %cst_20, %arg4[%c1_21] : memref<2xf32, #tpu.memory_space<smem>>
    } else {
    }
    %c0 = arith.constant 0 : index
    %c0_1 = arith.constant 0 : index
    %3 = vector.load %arg1[%c0, %c0_1] : memref<24x5xf32, #tpu.memory_space<vmem>>, vector<24x5xf32>
    %c0_2 = arith.constant 0 : index
    %c0_3 = arith.constant 0 : index
    %4 = vector.load %arg2[%c0_2, %c0_3] : memref<24x1xi32, #tpu.memory_space<vmem>>, vector<24x1xi32>
    %5 = tpu.iota {dimensions = array<i32: 0>} : vector<24x1xi32>
    %c24_i32 = arith.constant 24 : i32
    %6 = arith.muli %arg0, %c24_i32 : i32
    %7 = vector.broadcast %6 : i32 to vector<24x1xi32>
    %8 = arith.addi %7, %5 : vector<24x1xi32>
    %c20_i32 = arith.constant 20 : i32
    %9 = vector.broadcast %c20_i32 : i32 to vector<24x1xi32>
    %10 = arith.cmpi slt, %8, %9 : vector<24x1xi32>
    %cst = arith.constant dense<0xFF800000> : vector<24xf32>
    %11 = vector.multi_reduction <maximumf>, %3, %cst [1] : vector<24x5xf32> to vector<24xf32>
    %12 = vector.shape_cast %11 : vector<24xf32> to vector<24x1xf32>
    %13 = vector.broadcast %12 : vector<24x1xf32> to vector<24x5xf32>
    %14 = arith.subf %3, %13 : vector<24x5xf32>
    %15 = math.exp %14 : vector<24x5xf32>
    %cst_4 = arith.constant dense<0.000000e+00> : vector<24xf32>
    %16 = vector.multi_reduction <add>, %15, %cst_4 [1] : vector<24x5xf32> to vector<24xf32>
    %17 = vector.shape_cast %16 : vector<24xf32> to vector<24x1xf32>
    %18 = math.log %17 : vector<24x1xf32>
    %19 = arith.addf %18, %12 : vector<24x1xf32>
    %20 = tpu.iota {dimensions = array<i32: 1>} : vector<24x5xi32>
    %21 = vector.broadcast %4 : vector<24x1xi32> to vector<24x5xi32>
    %22 = arith.cmpi eq, %20, %21 : vector<24x5xi32>
    %cst_5 = arith.constant 0.000000e+00 : f32
    %23 = vector.broadcast %cst_5 : f32 to vector<24x5xf32>
    %24 = arith.select %22, %3, %23 : vector<24x5xi1>, vector<24x5xf32>
    %cst_6 = arith.constant dense<0.000000e+00> : vector<24xf32>
    %25 = vector.multi_reduction <add>, %24, %cst_6 [1] : vector<24x5xf32> to vector<24xf32>
    %26 = vector.shape_cast %25 : vector<24xf32> to vector<24x1xf32>
    %27 = arith.subf %19, %26 : vector<24x1xf32>
    %cst_7 = arith.constant 0.000000e+00 : f32
    %28 = vector.broadcast %cst_7 : f32 to vector<24x1xf32>
    %29 = arith.select %10, %27, %28 : vector<24x1xi1>, vector<24x1xf32>
    %30 = vector.broadcast %12 : vector<24x1xf32> to vector<24x5xf32>
    %31 = arith.cmpf oeq, %3, %30 : vector<24x5xf32>
    %c5_i32 = arith.constant 5 : i32
    %32 = vector.broadcast %c5_i32 : i32 to vector<24x5xi32>
    %33 = arith.select %31, %20, %32 : vector<24x5xi1>, vector<24x5xi32>
    %cst_8 = arith.constant dense<2147483647> : vector<24xi32>
    %34 = vector.multi_reduction <minsi>, %33, %cst_8 [1] : vector<24x5xi32> to vector<24xi32>
    %35 = vector.shape_cast %34 : vector<24xi32> to vector<24x1xi32>
    %36 = arith.cmpi eq, %35, %4 : vector<24x1xi32>
    %37 = arith.andi %10, %36 : vector<24x1xi1>
    %cst_9 = arith.constant 1.000000e+00 : f32
    %cst_10 = arith.constant 0.000000e+00 : f32
    %38 = vector.broadcast %cst_9 : f32 to vector<24x1xf32>
    %39 = vector.broadcast %cst_10 : f32 to vector<24x1xf32>
    %40 = arith.select %37, %38, %39 : vector<24x1xi1>, vector<24x1xf32>
    %c0_11 = arith.constant 0 : index
    %41 = memref.load %arg4[%c0_11] : memref<2xf32, #tpu.memory_space<smem>>
    %42 = vector.shape_cast %29 : vector<24x1xf32> to vector<1x24x1xf32>
    %cst_12 = arith.constant dense<0.000000e+00> : vector<1xf32>
    %43 = vector.multi_reduction <add>, %42, %cst_12 [1, 2] : vector<1x24x1xf32> to vector<1xf32>
    %44 = vector.shape_cast %43 : vector<1xf32> to vector<1x1x1xf32>
    %45 = vector.extract %44[0, 0, 0] : f32 from vector<1x1x1xf32>
    %46 = arith.addf %41, %45 : f32
    %c0_13 = arith.constant 0 : index
    %47 = memref.load %arg4[%c0_13] : memref<2xf32, #tpu.memory_space<smem>>
    memref.store %46, %arg4[%c0_13] : memref<2xf32, #tpu.memory_space<smem>>
    %c1 = arith.constant 1 : index
    %48 = memref.load %arg4[%c1] : memref<2xf32, #tpu.memory_space<smem>>
    %49 = vector.shape_cast %40 : vector<24x1xf32> to vector<1x24x1xf32>
    %cst_14 = arith.constant dense<0.000000e+00> : vector<1xf32>
    %50 = vector.multi_reduction <add>, %49, %cst_14 [1, 2] : vector<1x24x1xf32> to vector<1xf32>
    %51 = vector.shape_cast %50 : vector<1xf32> to vector<1x1x1xf32>
    %52 = vector.extract %51[0, 0, 0] : f32 from vector<1x1x1xf32>
    %53 = arith.addf %48, %52 : f32
    %c1_15 = arith.constant 1 : index
    %54 = memref.load %arg4[%c1_15] : memref<2xf32, #tpu.memory_space<smem>>
    memref.store %53, %arg4[%c1_15] : memref<2xf32, #tpu.memory_space<smem>>
    %c0_i32_16 = arith.constant 0 : i32
    %55 = arith.cmpi eq, %arg0, %c0_i32_16 : i32
    %56 = arith.extui %55 : i1 to i32
    %c0_i32_17 = arith.constant 0 : i32
    %57 = arith.cmpi ne, %56, %c0_i32_17 : i32
    scf.if %57 {
      %c0_18 = arith.constant 0 : index
      %58 = memref.load %arg4[%c0_18] : memref<2xf32, #tpu.memory_space<smem>>
      %cst_19 = arith.constant 5.000000e-02 : f32
      %59 = arith.mulf %58, %cst_19 : f32
      %c0_20 = arith.constant 0 : index
      %60 = memref.load %arg3[%c0_20] : memref<2xf32, #tpu.memory_space<smem>>
      memref.store %59, %arg3[%c0_20] : memref<2xf32, #tpu.memory_space<smem>>
      %c1_21 = arith.constant 1 : index
      %61 = memref.load %arg4[%c1_21] : memref<2xf32, #tpu.memory_space<smem>>
      %cst_22 = arith.constant 5.000000e-02 : f32
      %62 = arith.mulf %61, %cst_22 : f32
      %c1_23 = arith.constant 1 : index
      %63 = memref.load %arg3[%c1_23] : memref<2xf32, #tpu.memory_space<smem>>
      memref.store %62, %arg3[%c1_23] : memref<2xf32, #tpu.memory_space<smem>>
    } else {
    }
    return
  }
  func.func @transform_0(%arg0: i32) -> (i32, i32) {
    %c0_i32 = arith.constant 0 : i32
    %c0_i32_0 = arith.constant 0 : i32
    return %arg0, %c0_i32 : i32, i32
  }
  func.func @transform_1(%arg0: i32) -> (i32, i32) {
    %c0_i32 = arith.constant 0 : i32
    %c0_i32_0 = arith.constant 0 : i32
    return %arg0, %c0_i32 : i32, i32
  }
  func.func @transform_2(%arg0: i32) -> i32 {
    %c0_i32 = arith.constant 0 : i32
    %c0_i32_0 = arith.constant 0 : i32
    return %c0_i32 : i32
  }
}

</mosaic_0001>

<bundles_post_ra>
// kernel: tpu_custom_call.1
= control target key start
LH: loop header
LB: loop body
LE: loop exit
PB: predicated region body
PF: predicated region fallthrough
CT: control target
= control target key end

     0   :  { %vm38_vm0 = vcmask 39936   ;;  %s378_s0 = inlined_call_operand.vmem [shape: f32[24,5], index: 0, kind: input, shape index: {}]   ;;  %s379_s1 = inlined_call_operand.vmem [shape: s32[24,1], index: 1, kind: input, shape index: {}]   ;;  %s380_s2 = inlined_call_operand.hbm [shape: f32[2], index: 2, kind: output, shape index: {}]  }
   0x1   :  { %v284_v0 = vld [vmem:[%s378_s0] sm:$0xff]  ;;  %v21_v1 = vld [vmem:[%s378_s0 + $0x8] sm:$0xff]  ;;  %v292_v2 = vld [vmem:[%s378_s0 + $0x10] sm:$0xff] }
   0x2   :  { %v39_v3 = vsel %vm38_vm0, %v284_v0, -inf  ;;  %v45_v4 = vsel %vm38_vm0, %v292_v2, -inf }
   0x3   :  { %7 = vsyncpa [#allocation4], 0  ;;  %40 = vmax.xlane.f32.xlu0 %v39_v3  ;;  %46 = vmax.xlane.f32.xlu1 %v45_v4  ;;  %v42_v5 = vsel %vm38_vm0, %v21_v1, -inf  ;;  %v263_v6 = vmov 0   ;;  %v26_v7 = vlaneseq  ;;  %v316_v19 = vld [vmem:[%s379_s1 + $0x8] sm:$0xff]  ;;  %v322_v20 = vld [vmem:[%s379_s1] sm:$0xff] }
   0x4   :  { %238 = vset.pattern.permute.xlu1 %v263_v6  ;;  %237 = vset.pattern.permute.xlu0 %v263_v6  ;;  %v336_v30 = vld [vmem:[%s379_s1 + $0x10] sm:$0xff]  ;;  %vm168_vm12 = vcmask 7168   ;;  %s251_s25 = scalar_lea.hbm %s380_s2, 16 }
   0x5   :  { %v300_v8 = vand.u32 127, %v26_v7  ;;  %p252_p0 = scmp.ne.s32.totalorder %s380_s2, %s251_s25  ;;  %p255_p1 = scmp.lt.u32.totalorder %s251_s25, %s380_s2 }
   0x7   :  { %43 = vmax.xlane.f32.xlu0 %v42_v5  ;;  %p257_p2 = pnand %p255_p1, %p252_p0 }
  0x90   :  { %v302_v9 = vpop.xlane.xlu0 %40  ;;  %v325_v21 = vpop.xlane.xlu1 %46 }
  0x91   :  { %vm107_vm1 = vcmp.eq.f32.partialorder %v284_v0, %v302_v9  ;;  %vm109_vm3 = vcmp.eq.f32.partialorder %v292_v2, %v325_v21  ;;  %v48_v31 = vsub.f32 %v284_v0, %v302_v9  ;;  %v50_v35 = vsub.f32 %v292_v2, %v325_v21 }
  0x92   :  { %v110_v10 = vsel %vm107_vm1, %v300_v8, 5  ;;  %v112_v24 = vsel %vm109_vm3, %v300_v8, 5 }
  0x93   :  { %v113_v11 = vsel %vm38_vm0, %v110_v10, 2147483647  ;;  %v143_v25 = vsel %vm38_vm0, %v112_v24, 2147483647  ;;  %v51_v32 = vmul.f32 1.442695, %v48_v31 }
  0x94   :  { %v308_v12 = vpop.xlane.xlu0 %43  ;;  %v115_v13 = vshra.s32 %v113_v11, 16  ;;  %v145_v26 = vshra.s32 %v143_v25, 16  ;;  %v55_v37 = vmul.f32 1.442695, %v50_v35  ;;  %v114_v46 = vand.u32 65535, %v113_v11 }
  0x95   :  { %vm108_vm2 = vcmp.eq.f32.partialorder %v21_v1, %v308_v12  ;;  %v49_v22 = vsub.f32 %v21_v1, %v308_v12  ;;  %v144_v53 = vand.u32 65535, %v143_v25  ;;  %v27_v24 = vshrl.u32 %v26_v7, 7 }
  0x96   :  { %v117_v14 = vcvt.s32.f32 %v115_v13  ;;  %v111_v15 = vsel %vm108_vm2, %v300_v8, 5  ;;  %v147_v27 = vcvt.s32.f32 %v145_v26  ;;  %v116_v48 = vcvt.s32.f32 %v114_v46 }
  0x97   :  { %v128_v16 = vsel %vm38_vm0, %v111_v15, 2147483647  ;;  %v53_v23 = vmul.f32 1.442695, %v49_v22  ;;  %v146_v55 = vcvt.s32.f32 %v144_v53  ;;  %v264_v13 = vmov 0.0  }
  0x98   :  { %118 = vmin.xlane.f32.xlu1 %v117_v14  ;;  %v130_v17 = vshra.s32 %v128_v16, 16  ;;  %v129_v49 = vand.u32 65535, %v128_v16 }
  0x99   :  { %239 = vpow2.f32 %v53_v23 }
  0x9a   :  { %v132_v18 = vcvt.s32.f32 %v130_v17  ;;  %241 = vpow2.f32 %v51_v32  ;;  %v131_v51 = vcvt.s32.f32 %v129_v49 }
  0x9b   :  { %243 = vpow2.f32 %v55_v37 }
  0x9c   :  { %133 = vmin.xlane.f32.xlu0 %v132_v18 }
  0xa3   :  { %v240_v28 = vpop.eup %239 }
  0xa4   :  { %v60_v29 = vsel %vm38_vm0, %v240_v28, 0.0  ;;  %v242_v33 = vpop.eup %241  ;;  %v29_v28 = vadd.s32 16, %v27_v24 }
  0xa5   :  { %v57_v34 = vsel %vm38_vm0, %v242_v33, 0.0  ;;  %v244_v45 = vpop.eup %243 }
  0xa6   :  { %v63_v47 = vsel %vm38_vm0, %v244_v45, 0.0  ;;  %vm37_vm13 = vcmp.lt.s32.totalorder %v29_v28, 20 }
  0xa9   :  { %81 = vperm.xlu1 %238, %v316_v19  }
  0xb2   :  { %78 = vperm.xlu0 %237, %v322_v20  }
  0xcd   :  { %148 = vmin.xlane.f32.xlu1 %v147_v27 }
  0xd1   :  { %61 = vadd.xlane.f32.xlu0 %v60_v29 }
  0xde   :  { %84 = vperm.xlu1 %238, %v336_v30  }
 0x102   :  { %58 = vadd.xlane.f32.xlu1 %v57_v34 }
 0x125   :  { %v119_v36 = vpop.xlane.xlu1 %118 }
 0x126   :  { %vm120_vm6 = vcmp.eq.f32.partialorder %v117_v14, %v119_v36  ;;  %v125_v63 = vcvt.f32.s32 %v119_v36 }
 0x127   :  { %v121_v50 = vsel %vm120_vm6, %v116_v48, inf }
 0x129   :  { %v82_v38 = vpop.permute.xlu1 %81  ;;  %v134_v41 = vpop.xlane.xlu0 %133 }
 0x12a   :  { %vm87_vm4 = vcmp.eq.s32.totalorder %v300_v8, %v82_v38  ;;  %vm135_vm7 = vcmp.eq.f32.partialorder %v132_v18, %v134_v41  ;;  %v140_v3 = vcvt.f32.s32 %v134_v41 }
 0x12b   :  { %v90_v39 = vsel %vm87_vm4, %v21_v1, 0.0  ;;  %v136_v52 = vsel %vm135_vm7, %v131_v51, inf  ;;  %v126_v1 = vshll.u32 %v125_v63, 16 }
 0x12c   :  { %v95_v40 = vsel %vm38_vm0, %v90_v39, 0.0  ;;  %v141_v10 = vshll.u32 %v140_v3, 16 }
 0x12d   :  { %96 = vadd.xlane.f32.xlu0 %v95_v40 }
 0x131   :  { %v79_v42 = vpop.permute.xlu0 %78 }
 0x132   :  { %vm86_vm5 = vcmp.eq.s32.totalorder %v300_v8, %v79_v42 }
 0x133   :  { %v89_v43 = vsel %vm86_vm5, %v284_v0, 0.0 }
 0x134   :  { %v92_v44 = vsel %vm38_vm0, %v89_v43, 0.0 }
 0x135   :  { %93 = vadd.xlane.f32.xlu1 %v92_v44 }
 0x139   :  { %64 = vadd.xlane.f32.xlu1 %v63_v47 }
 0x13d   :  { %122 = vmin.xlane.f32.xlu1 %v121_v50 }
 0x141   :  { %137 = vmin.xlane.f32.xlu1 %v136_v52 }
 0x15a   :  { %v149_v54 = vpop.xlane.xlu1 %148 }
 0x15b   :  { %vm150_vm8 = vcmp.eq.f32.partialorder %v147_v27, %v149_v54  ;;  %v155_v26 = vcvt.f32.s32 %v149_v54 }
 0x15c   :  { %v151_v56 = vsel %vm150_vm8, %v146_v55, inf }
 0x15d   :  { %152 = vmin.xlane.f32.xlu1 %v151_v56  ;;  %v156_v33 = vshll.u32 %v155_v26, 16 }
 0x15e   :  { %v85_v57 = vpop.permute.xlu1 %84  ;;  %v62_v18 = vpop.xlane.xlu0 %61 }
 0x15f   :  { %vm88_vm9 = vcmp.eq.s32.totalorder %v300_v8, %v85_v57 }
 0x160   :  { %v91_v58 = vsel %vm88_vm9, %v292_v2, 0.0 }
 0x161   :  { %v98_v59 = vsel %vm38_vm0, %v91_v58, 0.0 }
 0x162   :  { %99 = vadd.xlane.f32.xlu1 %v98_v59 }
 0x18f   :  { %v59_v60 = vpop.xlane.xlu1 %58 }
 0x190   :  { %245 = vlog2.f32 %v59_v60 }
 0x191   :  { %247 = vlog2.f32 %v62_v18 }
 0x19a   :  { %v246_v22 = vpop.eup %245 }
 0x19b   :  { %v248_v23 = vpop.eup %247 }
 0x19c   :  { %v69_v27 = vmul.f32 0.6931472, %v248_v23 }
 0x19e   :  { %v73_v34 = vadd.f32 %v69_v27, %v308_v12 }
 0x1ba   :  { %v97_v29 = vpop.xlane.xlu0 %96 }
 0x1bb   :  { %v102_v37 = vsub.f32 %v73_v34, %v97_v29 }
 0x1bd   :  { %v170_v41 = vsel %vm168_vm12, %v102_v37, 0.0 }
 0x1c2   :  { %v94_v61 = vpop.xlane.xlu1 %93 }
 0x1c6   :  { %v65_v62 = vpop.xlane.xlu1 %64 }
 0x1c7   :  { %249 = vlog2.f32 %v65_v62 }
 0x1ca   :  { %v123_v0 = vpop.xlane.xlu1 %122 }
 0x1cb   :  { %v124_v4 = vcvt.f32.s32 %v123_v0 }
 0x1cd   :  { %v127_v5 = vadd.s32 %v126_v1, %v124_v4 }
 0x1ce   :  { %v138_v6 = vpop.xlane.xlu1 %137 }
 0x1cf   :  { %vm158_vm10 = vcmp.eq.s32.totalorder %v127_v5, %v322_v20  ;;  %v139_v11 = vcvt.f32.s32 %v138_v6  ;;  %v67_v20 = vmul.f32 0.6931472, %v246_v22 }
 0x1d0   :  { %v164_v2 = vsel %vm158_vm10, 1.0, %v264_v13 }
 0x1d1   :  { %v142_v8 = vadd.s32 %v141_v10, %v139_v11  ;;  %v187_v15 = vsel %vm168_vm12, %v164_v2, 0.0  ;;  %v250_v25 = vpop.eup %249 }
 0x1d2   :  { %v71_v31 = vmul.f32 0.6931472, %v250_v25 }
 0x1d3   :  { %vm159_vm11 = vcmp.eq.s32.totalorder %v142_v8, %v316_v19  ;;  %v72_v19 = vadd.f32 %v67_v20, %v302_v9 }
 0x1d4   :  { %v165_v14 = vsel %vm159_vm11, 1.0, %v264_v13  ;;  %v74_v39 = vadd.f32 %v71_v31, %v325_v21 }
 0x1d5   :  { %v188_v16 = vsel %vm168_vm12, %v165_v14, 0.0  ;;  %v101_v35 = vsub.f32 %v72_v19, %v94_v61 }
 0x1d6   :  { %v189_v17 = vadd.f32 %v188_v16, %v187_v15 }
 0x1d7   :  { %v169_v7 = vsel %vm168_vm12, %v101_v35, 0.0 }
 0x1d8   :  { %v171_v44 = vadd.f32 %v170_v41, %v169_v7 }
 0x1ea   :  { %v153_v32 = vpop.xlane.xlu1 %152 }
 0x1eb   :  { %v154_v36 = vcvt.f32.s32 %v153_v32 }
 0x1ed   :  { %v157_v38 = vadd.s32 %v156_v33, %v154_v36 }
 0x1ef   :  { %vm160_vm14 = vcmp.eq.s32.totalorder %v157_v38, %v336_v30  ;;  %v100_v40 = vpop.xlane.xlu1 %99 }
 0x1f0   :  { %v103_v9 = vsub.f32 %v74_v39, %v100_v40  ;;  %vm163_vm15 = vmand %vm37_vm13, %vm160_vm14 }
 0x1f1   :  { %v166_v42 = vsel %vm163_vm15, 1.0, %v264_v13 }
 0x1f2   :  { %v106_v43 = vsel %vm37_vm13, %v103_v9, 0.0  ;;  %v190_v12 = vsel %vm168_vm12, %v166_v42, 0.0 }
 0x1f3   :  { %v191_v45 = vadd.f32 %v190_v12, %v189_v17  ;;  %v172_v46 = vsel %vm168_vm12, %v106_v43, 0.0 }
 0x1f4   :  { %v173_v47 = vadd.f32 %v172_v46, %v171_v44 }
 0x1f5   :  { %192 = vadd.xlane.f32.xlu1 %v191_v45 }
 0x1f6   :  { %174 = vadd.xlane.f32.xlu0 %v173_v47 }
 0x282   :  { %v193_v21 = vpop.xlane.xlu1 %192 }
 0x283   :  { %v194_v48 = vrot.slane %v193_v21, 4  ;;  %v175_v49 = vpop.xlane.xlu0 %174 }
 0x284   :  { %v176_v30 = vrot.slane %v175_v49, 4 }
 0x285   :  { %v195_v50 = vadd.f32 %v194_v48, %v193_v21 }
 0x286   :  { %v177_v51 = vadd.f32 %v176_v30, %v175_v49 }
 0x287   :  { %v196_v52 = vrot.slane %v195_v50, 2 }
 0x288   :  { %v178_v53 = vrot.slane %v177_v51, 2 }
 0x289   :  { %v197_v54 = vadd.f32 %v196_v52, %v195_v50 }
 0x28a   :  { %v179_v55 = vadd.f32 %v178_v53, %v177_v51 }
 0x28b   :  { %v198_v56 = vrot.slane %v197_v54, 1 }
 0x28c   :  { %v180_v57 = vrot.slane %v179_v55, 1 }
 0x28d   :  { %v199_v58 = vadd.f32 %v198_v56, %v197_v54 }
 0x28e   :  { %v181_v59 = vadd.f32 %v180_v57, %v179_v55 }
 0x290   :  { %230 = vpush %v181_v59 }
 0x291   :  { %232 = vpush %v199_v58 }
 0x2c1   :  { %s231_s1 = spop %230 }
 0x2c2   :  { %s208_s20 = smul.f32 0.05, %s231_s1  ;;  %s233_s21 = spop %232 }
 0x2c3   :  { %s212_s22 = smul.f32 0.05, %s233_s21 }
 0x2c4   :  { %210 = sst [smem:[#allocation3]] %s208_s20 }
 0x2c5   :  { %214 = sst [smem:[#allocation3 + $0x1]] %s212_s22 }
 0x2c6   :  { %260 = shalt.err (!%p257_p2)
}
 0x2c7   :  { %s265_s30 = smov [#allocation3]  }
 0x2c8   :  { %222 = dma.smem_to_hbm %s265_s30, 16, %s380_s2, [#allocation4]  }
 0x2c9   :  { %261 = dma.done.wait [#allocation4], 16  }
 0x2ca   :  { %262 = vsyncadd [#allocation4], 4294967280 }
 0x2cb   :  { %226 = sfence }
 0x2cc   :  { %227 = vsyncpa [#allocation4], 1 }

</bundles_post_ra>
